<compile_context>
chip_gen: v7x
topology: tpu7x:2x2x1
jax: 0.10.0
libtpu: 0.0.40
codegen_flags: <defaults>
</compile_context>

<pallas_src>
import functools

import jax
import jax.numpy as jnp
from jax.experimental import pallas as pl
from jax.experimental.pallas import tpu as pltpu

BN_EPS = 1e-5
LANE = 128
NEG_BIG = -1e30  # finite "minus infinity" for masked softmax lanes


def _round_up(x: int, m: int) -> int:
    return ((x + m - 1) // m) * m


def _cdiv(a: int, b: int) -> int:
    return (a + b - 1) // b


# ----------------------------------------------------------------------------
# Kernel
# ----------------------------------------------------------------------------
def az_mlp_kernel(x_ref, w0_ref, w_ref, b_ref, out_ref, *, num_hidden, io_units):
    """Fused AlphaZero MLP forward.

    x_ref   : (TB, in_feats)       bf16 activations (true feature width, no pad)
    w0_ref  : (in_feats, F)        bf16 first-layer weights
    w_ref   : (num_hidden, F, F)   bf16 packed/padded/BN-folded weights; the
                                   last entry is the fused policy+value head
                                   (value weights = column io_units)
    b_ref   : (num_hidden+1, 1, F) f32 packed biases
    out_ref : (TB, F)              f32 lane-dense output:
                                   cols [0, io_units) = softmax policy,
                                   col io_units = tanh(value), rest = 0
    """
    # First hidden layer: Linear -> ReLU.  (Eval-mode BatchNorm scale is
    # pre-folded into the *next* layer's weights; Dropout is identity.)
    h = jnp.dot(x_ref[...], w0_ref[...],
                preferred_element_type=jnp.float32) + b_ref[0]
    h = jnp.maximum(h, 0.0)

    # Remaining hidden layers.
    for l in range(1, num_hidden):
        h = jnp.dot(h.astype(jnp.bfloat16), w_ref[l - 1],
                    preferred_element_type=jnp.float32) + b_ref[l]
        h = jnp.maximum(h, 0.0)

    # Fused policy+value head: one MXU pass over the lane-dense padded width.
    z = jnp.dot(h.astype(jnp.bfloat16), w_ref[num_hidden - 1],
                preferred_element_type=jnp.float32) + b_ref[num_hidden]

    col = jax.lax.broadcasted_iota(jnp.int32, (1, z.shape[1]), 1)
    is_policy = col < io_units

    # Masked softmax over the io_units policy logits only (f32, exact divide).
    logits = jnp.where(is_policy, z, NEG_BIG)
    m = jnp.max(logits, axis=1, keepdims=True)
    e = jnp.exp(logits - m)                       # masked lanes underflow to 0
    p = e / jnp.sum(e, axis=1, keepdims=True)     # exact -> rows sum to 1

    v = jnp.tanh(z)                               # only col io_units is used
    out_ref[...] = jnp.where(col == io_units, v, p)


# ----------------------------------------------------------------------------
# Wrapper
# ----------------------------------------------------------------------------
def az_forward_pallas(s, w0, w_slab, b_slab, io_units, *, tb_max=512):
    """s: [B, io_units].  Returns (p: [B, io_units] f32, v: [B] f32 squeezed)."""
    B, in_feats = s.shape
    num_hidden, _, F = w_slab.shape
    L = num_hidden + 1

    # Batch tiling: cdiv-based tile choice; >=2 tiles when B_pad >= 16 so the
    # "parallel" grid axis can shard across both v7x TensorCores.
    B_pad = _round_up(max(B, 1), 8)
    n_tiles = _cdiv(B_pad, tb_max)
    if B_pad >= 16:
        n_tiles = max(n_tiles, 2)
    tb = _round_up(_cdiv(B_pad, n_tiles), 8)
    B_pad = tb * n_tiles

    # Batch-pad only; feature width stays at the true io_units (bf16 input).
    x = jnp.zeros((B_pad, in_feats), jnp.bfloat16).at[:B, :].set(
        s.astype(jnp.bfloat16))

    cost = pl.CostEstimate(
        flops=2 * B_pad * (in_feats * F + num_hidden * F * F),
        transcendentals=2 * B_pad * F,                       # exp + tanh
        bytes_accessed=(B_pad * in_feats * 2 + in_feats * F * 2
                        + num_hidden * F * F * 2 + L * F * 4
                        + B_pad * F * 4))

    out = pl.pallas_call(
        functools.partial(az_mlp_kernel,
                          num_hidden=num_hidden, io_units=io_units),
        out_shape=jax.ShapeDtypeStruct((B_pad, F), jnp.float32),
        grid_spec=pltpu.PrefetchScalarGridSpec(
            num_scalar_prefetch=0,
            grid=(n_tiles,),
            in_specs=[
                pl.BlockSpec((tb, in_feats), lambda i: (i, 0)),     # activations
                pl.BlockSpec((in_feats, F), lambda i: (0, 0)),      # layer-0 W
                pl.BlockSpec((num_hidden, F, F), lambda i: (0, 0, 0)),  # W slab
                pl.BlockSpec((L, 1, F), lambda i: (0, 0, 0)),       # biases
            ],
            out_specs=pl.BlockSpec((tb, F), lambda i: (i, 0)),
        ),
        compiler_params=pltpu.CompilerParams(
            dimension_semantics=("parallel",),     # shard batch tiles across TCs
            vmem_limit_bytes=32 * 1024 * 1024),
        cost_estimate=cost,
    )(x, w0, w_slab, b_slab)

    p = out[:B, :io_units]
    v = jnp.squeeze(out[:B, io_units])             # matches torch .squeeze()
    return p, v


# ----------------------------------------------------------------------------
# Parameters: PyTorch-style init + one-time packing (fusion / fold / pad)
# ----------------------------------------------------------------------------
def init_params(key, io_units, hidden_layers):
    """Mirror the PyTorch module init: xavier_normal_ weights, biases = 0.01.
       Weights stored as [in_features, out_features] (pre-transposed)."""
    def xavier(k, fan_in, fan_out):
        std = jnp.sqrt(2.0 / (fan_in + fan_out))
        return jax.random.normal(k, (fan_in, fan_out), jnp.float32) * std

    dims = [io_units] + list(hidden_layers)
    keys = jax.random.split(key, len(hidden_layers) + 2)
    params = []
    for i in range(len(hidden_layers)):
        params += [xavier(keys[i], dims[i], dims[i + 1]),
                   jnp.full((1, dims[i + 1]), 0.01, jnp.float32)]
    params += [xavier(keys[-2], hidden_layers[-1], io_units),   # policy head
               jnp.full((1, io_units), 0.01, jnp.float32),
               xavier(keys[-1], hidden_layers[-1], 1),          # value head
               jnp.full((1, 1), 0.01, jnp.float32)]
    return tuple(params)


def pack_params(params, io_units, hidden_layers):
    """One-time host-side transform:
       - fuse value head as the extra column io_units of the policy head
       - fold eval-mode BN scale 1/sqrt(1+eps) into the *next* layer's weights
       - keep the first layer as a separate [io_units, F] slab (true K)
       - zero-pad the remaining layers to [F, F] (F = multiple of 128), stack,
         and store all weights in bf16 for the MXU (biases stay f32)."""
    n_h = len(hidden_layers)
    inv_bn = 1.0 / jnp.sqrt(1.0 + BN_EPS)

    hidden_w = [params[2 * i] for i in range(n_h)]
    hidden_b = [params[2 * i + 1] for i in range(n_h)]
    wp, bp, wv, bv = params[2 * n_h:2 * n_h + 4]

    w_heads = jnp.concatenate([wp, wv], axis=1)                 # [h_last, io+1]
    b_heads = jnp.concatenate([bp.reshape(1, -1), bv.reshape(1, -1)], axis=1)

    ws = list(hidden_w) + [w_heads]
    bs = [b.reshape(1, -1) for b in hidden_b] + [b_heads]
    for l in range(1, len(ws)):          # one BN follows each hidden layer
        ws[l] = ws[l] * inv_bn

    F = _round_up(max([io_units + 1] + list(hidden_layers)), LANE)

    # First layer: true input width, padded output width, bf16.
    w0 = jnp.zeros((io_units, F), jnp.float32)
    w0 = w0.at[:, :hidden_layers[0]].set(ws[0]).astype(jnp.bfloat16)

    # Remaining hidden layers + fused head: [n_h, F, F] bf16 slab.
    w_slab = jnp.zeros((n_h, F, F), jnp.float32)
    for l in range(1, n_h + 1):
        di, do = ws[l].shape
        w_slab = w_slab.at[l - 1, :di, :do].set(ws[l])
    w_slab = w_slab.astype(jnp.bfloat16)

    # Biases: [n_h+1, 1, F] f32 slab (added after f32 accumulation).
    b_slab = jnp.zeros((n_h + 1, 1, F), jnp.float32)
    for l in range(n_h + 1):
        b_slab = b_slab.at[l, 0, :bs[l].shape[1]].set(bs[l].reshape(-1))

    return w0, w_slab, b_slab


# ----------------------------------------------------------------------------
# Pure-JAX f32 reference (identical eval-mode semantics, unfused)
# ----------------------------------------------------------------------------
def az_forward_ref(s, params, hidden_layers):
    n_h = len(hidden_layers)
    inv_bn = 1.0 / jnp.sqrt(1.0 + BN_EPS)
    h = s
    for i in range(n_h):
        w, b = params[2 * i], params[2 * i + 1]
        h = jnp.maximum(h @ w + b, 0.0) * inv_bn
    wp, bp, wv, bv = params[2 * n_h:2 * n_h + 4]
    p = jax.nn.softmax(h @ wp + bp, axis=1)
    v = jnp.tanh(h @ wv + bv)
    return p, jnp.squeeze(v)


if __name__ == "__main__":
    game_size = 3                         # io_units = 2*3*(3+1) = 24
    io_units = 2 * game_size * (game_size + 1)
    hidden_layers = [32, 32]
    batch = 2

    key = jax.random.PRNGKey(0)
    k_params, k_x = jax.random.split(key)
    params = init_params(k_params, io_units, hidden_layers)
    w0, w_slab, b_slab = pack_params(params, io_units, hidden_layers)

    # canonical-form position vectors in {-1, 0, 1}
    x = jax.random.randint(k_x, (batch, io_units), -1, 2).astype(jnp.float32)

    p, v = az_forward_pallas(x, w0, w_slab, b_slab, io_units)
    p = jax.block_until_ready(p)
    v = jax.block_until_ready(v)

    p_ref, v_ref = az_forward_ref(x, params, hidden_layers)
    assert p.shape == (batch, io_units) and v.shape == (batch,)
    # Loose tolerance vs. the f32 reference accounts for bf16 matmul operands.
    assert jnp.allclose(p, p_ref, atol=2e-2, rtol=2e-2)
    assert jnp.allclose(v, v_ref, atol=2e-2, rtol=2e-2)
    # Exact softmax normalization: rows must sum to 1 to f32 rounding.
    assert jnp.allclose(jnp.sum(p, axis=1), 1.0, atol=1e-4)

    print("KERNEL_OK")
</pallas_src>

<mosaic_0001>
module attributes {stable_mosaic.version = 11 : i64} {
  func.func @az_mlp_kernel(%arg0: i32, %arg1: memref<8x24xbf16, #tpu.memory_space<vmem>>, %arg2: memref<24x128xbf16, #tpu.memory_space<vmem>>, %arg3: memref<2x128x128xbf16, #tpu.memory_space<vmem>>, %arg4: memref<3x1x128xf32, #tpu.memory_space<vmem>>, %arg5: memref<8x128xf32, #tpu.memory_space<vmem>>) attributes {dimension_semantics = [#tpu.dimension_semantics<parallel>], iteration_bounds = array<i64: 1>, scalar_prefetch = 0 : i64, scratch_operands = 0 : i64, tpu.core_type = #tpu.core_type<tc>, window_params = [{transform_indices = @transform_0, window_bounds = array<i64: 8, 24>}, {pipeline_mode = #tpu.pipeline_mode<synchronous>, transform_indices = @transform_1, window_bounds = array<i64: 24, 128>}, {pipeline_mode = #tpu.pipeline_mode<synchronous>, transform_indices = @transform_2, window_bounds = array<i64: 2, 128, 128>}, {pipeline_mode = #tpu.pipeline_mode<synchronous>, transform_indices = @transform_3, window_bounds = array<i64: 3, 1, 128>}, {transform_indices = @transform_4, window_bounds = array<i64: 8, 128>}]} {
    %c0 = arith.constant 0 : index
    %c0_0 = arith.constant 0 : index
    %0 = vector.load %arg1[%c0, %c0_0] : memref<8x24xbf16, #tpu.memory_space<vmem>>, vector<8x24xbf16>
    %c0_1 = arith.constant 0 : index
    %c0_2 = arith.constant 0 : index
    %1 = vector.load %arg2[%c0_1, %c0_2] : memref<24x128xbf16, #tpu.memory_space<vmem>>, vector<24x128xbf16>
    %cst = arith.constant dense<0.000000e+00> : vector<8x128xf32>
    %2 = tpu.matmul %0, %1, %cst {dimension_numbers = #tpu.dot_dimension_numbers<[1], [0], [0], [1], [0, 0, 1, 1], [], []>} : vector<8x24xbf16>, vector<24x128xbf16>, vector<8x128xf32> -> vector<8x128xf32>
    %c0_3 = arith.constant 0 : index
    %c0_4 = arith.constant 0 : index
    %c0_5 = arith.constant 0 : index
    %3 = vector.load %arg4[%c0_3, %c0_4, %c0_5] : memref<3x1x128xf32, #tpu.memory_space<vmem>>, vector<1x1x128xf32>
    %4 = vector.shape_cast %3 : vector<1x1x128xf32> to vector<1x128xf32>
    %5 = vector.broadcast %4 : vector<1x128xf32> to vector<8x128xf32>
    %6 = arith.addf %2, %5 : vector<8x128xf32>
    %cst_6 = arith.constant 0.000000e+00 : f32
    %7 = vector.broadcast %cst_6 : f32 to vector<8x128xf32>
    %8 = arith.maximumf %6, %7 : vector<8x128xf32>
    %9 = arith.truncf %8 : vector<8x128xf32> to vector<8x128xbf16>
    %c0_7 = arith.constant 0 : index
    %c0_8 = arith.constant 0 : index
    %c0_9 = arith.constant 0 : index
    %10 = vector.load %arg3[%c0_7, %c0_8, %c0_9] : memref<2x128x128xbf16, #tpu.memory_space<vmem>>, vector<1x128x128xbf16>
    %11 = vector.shape_cast %10 : vector<1x128x128xbf16> to vector<128x128xbf16>
    %cst_10 = arith.constant dense<0.000000e+00> : vector<8x128xf32>
    %12 = tpu.matmul %9, %11, %cst_10 {dimension_numbers = #tpu.dot_dimension_numbers<[1], [0], [0], [1], [0, 0, 1, 1], [], []>} : vector<8x128xbf16>, vector<128x128xbf16>, vector<8x128xf32> -> vector<8x128xf32>
    %c1 = arith.constant 1 : index
    %c0_11 = arith.constant 0 : index
    %c0_12 = arith.constant 0 : index
    %13 = vector.load %arg4[%c1, %c0_11, %c0_12] : memref<3x1x128xf32, #tpu.memory_space<vmem>>, vector<1x1x128xf32>
    %14 = vector.shape_cast %13 : vector<1x1x128xf32> to vector<1x128xf32>
    %15 = vector.broadcast %14 : vector<1x128xf32> to vector<8x128xf32>
    %16 = arith.addf %12, %15 : vector<8x128xf32>
    %cst_13 = arith.constant 0.000000e+00 : f32
    %17 = vector.broadcast %cst_13 : f32 to vector<8x128xf32>
    %18 = arith.maximumf %16, %17 : vector<8x128xf32>
    %19 = arith.truncf %18 : vector<8x128xf32> to vector<8x128xbf16>
    %c1_14 = arith.constant 1 : index
    %c0_15 = arith.constant 0 : index
    %c0_16 = arith.constant 0 : index
    %20 = vector.load %arg3[%c1_14, %c0_15, %c0_16] : memref<2x128x128xbf16, #tpu.memory_space<vmem>>, vector<1x128x128xbf16>
    %21 = vector.shape_cast %20 : vector<1x128x128xbf16> to vector<128x128xbf16>
    %cst_17 = arith.constant dense<0.000000e+00> : vector<8x128xf32>
    %22 = tpu.matmul %19, %21, %cst_17 {dimension_numbers = #tpu.dot_dimension_numbers<[1], [0], [0], [1], [0, 0, 1, 1], [], []>} : vector<8x128xbf16>, vector<128x128xbf16>, vector<8x128xf32> -> vector<8x128xf32>
    %c2 = arith.constant 2 : index
    %c0_18 = arith.constant 0 : index
    %c0_19 = arith.constant 0 : index
    %23 = vector.load %arg4[%c2, %c0_18, %c0_19] : memref<3x1x128xf32, #tpu.memory_space<vmem>>, vector<1x1x128xf32>
    %24 = vector.shape_cast %23 : vector<1x1x128xf32> to vector<1x128xf32>
    %25 = vector.broadcast %24 : vector<1x128xf32> to vector<8x128xf32>
    %26 = arith.addf %22, %25 : vector<8x128xf32>
    %27 = tpu.iota {dimensions = array<i32: 1>} : vector<1x128xi32>
    %c24_i32 = arith.constant 24 : i32
    %28 = vector.broadcast %c24_i32 : i32 to vector<1x128xi32>
    %29 = arith.cmpi slt, %27, %28 : vector<1x128xi32>
    %cst_20 = arith.constant -1.000000e+30 : f32
    %30 = vector.shape_cast %29 : vector<1x128xi1> to vector<1x128xi1>
    %31 = vector.broadcast %30 : vector<1x128xi1> to vector<8x128xi1>
    %32 = vector.broadcast %cst_20 : f32 to vector<8x128xf32>
    %33 = arith.select %31, %26, %32 : vector<8x128xi1>, vector<8x128xf32>
    %cst_21 = arith.constant dense<0xFF800000> : vector<8xf32>
    %34 = vector.multi_reduction <maximumf>, %33, %cst_21 [1] : vector<8x128xf32> to vector<8xf32>
    %35 = vector.shape_cast %34 : vector<8xf32> to vector<8x1xf32>
    %36 = vector.broadcast %35 : vector<8x1xf32> to vector<8x128xf32>
    %37 = arith.subf %33, %36 : vector<8x128xf32>
    %38 = math.exp %37 : vector<8x128xf32>
    %cst_22 = arith.constant dense<0.000000e+00> : vector<8xf32>
    %39 = vector.multi_reduction <add>, %38, %cst_22 [1] : vector<8x128xf32> to vector<8xf32>
    %40 = vector.shape_cast %39 : vector<8xf32> to vector<8x1xf32>
    %41 = vector.broadcast %40 : vector<8x1xf32> to vector<8x128xf32>
    %42 = arith.divf %38, %41 : vector<8x128xf32>
    %43 = math.tanh %26 : vector<8x128xf32>
    %c24_i32_23 = arith.constant 24 : i32
    %44 = vector.broadcast %c24_i32_23 : i32 to vector<1x128xi32>
    %45 = arith.cmpi eq, %27, %44 : vector<1x128xi32>
    %46 = vector.shape_cast %45 : vector<1x128xi1> to vector<1x128xi1>
    %47 = vector.broadcast %46 : vector<1x128xi1> to vector<8x128xi1>
    %48 = arith.select %47, %43, %42 : vector<8x128xi1>, vector<8x128xf32>
    %c0_24 = arith.constant 0 : index
    %c0_25 = arith.constant 0 : index
    %49 = vector.load %arg5[%c0_24, %c0_25] : memref<8x128xf32, #tpu.memory_space<vmem>>, vector<8x128xf32>
    tpu.vector_store %arg5[%c0_24, %c0_25], %48 {strides = array<i32>} : memref<8x128xf32, #tpu.memory_space<vmem>>, vector<8x128xf32>,
    return
  }
  func.func @transform_0(%arg0: i32) -> (i32, i32) {
    %c0_i32 = arith.constant 0 : i32
    %c0_i32_0 = arith.constant 0 : i32
    return %arg0, %c0_i32 : i32, i32
  }
  func.func @transform_1(%arg0: i32) -> (i32, i32) {
    %c0_i32 = arith.constant 0 : i32
    %c0_i32_0 = arith.constant 0 : i32
    %c0_i32_1 = arith.constant 0 : i32
    return %c0_i32, %c0_i32_0 : i32, i32
  }
  func.func @transform_2(%arg0: i32) -> (i32, i32, i32) {
    %c0_i32 = arith.constant 0 : i32
    %c0_i32_0 = arith.constant 0 : i32
    %c0_i32_1 = arith.constant 0 : i32
    %c0_i32_2 = arith.constant 0 : i32
    return %c0_i32, %c0_i32_0, %c0_i32_1 : i32, i32, i32
  }
  func.func @transform_3(%arg0: i32) -> (i32, i32, i32) {
    %c0_i32 = arith.constant 0 : i32
    %c0_i32_0 = arith.constant 0 : i32
    %c0_i32_1 = arith.constant 0 : i32
    %c0_i32_2 = arith.constant 0 : i32
    return %c0_i32, %c0_i32_0, %c0_i32_1 : i32, i32, i32
  }
  func.func @transform_4(%arg0: i32) -> (i32, i32) {
    %c0_i32 = arith.constant 0 : i32
    %c0_i32_0 = arith.constant 0 : i32
    return %arg0, %c0_i32 : i32, i32
  }
}

</mosaic_0001>

<bundles_post_ra>
// kernel: tpu_custom_call.1
= control target key start
LH: loop header
LB: loop body
LE: loop exit
PB: predicated region body
PF: predicated region fallthrough
CT: control target
= control target key end

     0   :  { %9 = vsyncpa [#allocation3], 0  ;;  %s731_s0 = inlined_call_operand.hbm [shape: bf16[8,24], index: 0, kind: input, shape index: {}]   ;;  %s732_s1 = inlined_call_operand.hbm [shape: bf16[24,128], index: 1, kind: input, shape index: {}]   ;;  %s733_s2 = inlined_call_operand.hbm [shape: bf16[2,128,128], index: 2, kind: input, shape index: {}]   ;;  %s734_s3 = inlined_call_operand.vmem [shape: f32[3,1,128], index: 3, kind: input, shape index: {}]   ;;  %s735_s4 = inlined_call_operand.hbm [shape: f32[8,128], index: 4, kind: output, shape index: {}]  }
   0x1   :  { %10 = vsyncpa [#allocation6], 0 }
   0x2   :  { %11 = vsyncpa [#allocation4], 0  ;;  %s611_s15 = smov [#allocation5]   ;;  %s517_s19 = scalar_lea.hbm %s732_s1, 192 }
   0x3   :  { %s27_s16 = sshll.u32 %s611_s15, 4  ;;  %p518_p0 = scmp.ne.s32.totalorder %s732_s1, %s517_s19  ;;  %s28_s16 = int_to_ptr.vmem [resolvable:$true] %s27_s16 }
   0x4   :  { %p521_p1 = scmp.lt.u32.totalorder %s517_s19, %s732_s1 }
   0x6   :  { %p523_p2 = pnand %p521_p1, %p518_p0 }
   0x8   :  { %526 = shalt.err (!%p523_p2)
}
   0x9   :  { %s527_s24 = scalar_lea.vmem %s28_s16, 192  ;;  %p532_p4 = scmp.lt.s32.totalorder %s28_s16, %s28_s16 }
   0xa   :  { %p528_p3 = scmp.ne.s32.totalorder %s28_s16, %s527_s24  ;;  %p533_p5 = scmp.lt.s32.totalorder %s527_s24, %s527_s24 }
   0xc   :  { %p534_p6 = por %p533_p5, %p532_p4 }
   0xe   :  { %p535_p7 = pnand %p534_p6, %p528_p3 }
  0x10   :  { %538 = shalt.err (!%p535_p7)
}
  0x11   :  { %s612_s25 = smov 64   ;;  %s613_s26 = smov 4  }
  0x12   :  { %33 = dma.hbm_to_vmem [thread:$0]  %s732_s1, 192, %s28_s16, [#allocation6], %s612_s25, %s612_s25, %s613_s26  }
  0x13   :  { %s614_s29 = smov [#allocation2]   ;;  %s615_s5 = smov [#allocation7]  }
  0x14   :  { %s18_s30 = sshll.u32 %s614_s29, 4  ;;  %s39_s6 = sshll.u32 %s615_s5, 4  ;;  %s19_s30 = int_to_ptr.vmem [resolvable:$true] %s18_s30  ;;  %s40_s6 = int_to_ptr.vmem [resolvable:$true] %s39_s6 }
  0x15   :  { %s539_s9 = scalar_lea.hbm %s731_s0, 64 }
  0x16   :  { %p540_p8 = scmp.ne.s32.totalorder %s731_s0, %s539_s9  ;;  %p543_p9 = scmp.lt.u32.totalorder %s539_s9, %s731_s0 }
  0x18   :  { %p545_p10 = pnand %p543_p9, %p540_p8 }
  0x1a   :  { %548 = shalt.err (!%p545_p10)
}
  0x1b   :  { %s549_s1 = scalar_lea.vmem %s19_s30, 64  ;;  %p554_p12 = scmp.lt.s32.totalorder %s19_s30, %s19_s30 }
  0x1c   :  { %p550_p11 = scmp.ne.s32.totalorder %s19_s30, %s549_s1  ;;  %p555_p13 = scmp.lt.s32.totalorder %s549_s1, %s549_s1 }
  0x1e   :  { %p556_p0 = por %p555_p13, %p554_p12 }
  0x20   :  { %p557_p1 = pnand %p556_p0, %p550_p11 }
  0x22   :  { %560 = shalt.err (!%p557_p1)
}
  0x23   :  { %21 = dma.hbm_to_vmem [thread:$0]  %s731_s0, 64, %s19_s30, [#allocation3]  }
  0x24   :  { %s561_s18 = scalar_lea.hbm %s733_s2, 2048 }
  0x25   :  { %p562_p2 = scmp.ne.s32.totalorder %s733_s2, %s561_s18  ;;  %p565_p3 = scmp.lt.u32.totalorder %s561_s18, %s733_s2 }
  0x27   :  { %p567_p4 = pnand %p565_p3, %p562_p2 }
  0x29   :  { %570 = shalt.err (!%p567_p4)
}
  0x2a   :  { %s571_s23 = scalar_lea.vmem %s40_s6, 2048  ;;  %p576_p6 = scmp.lt.s32.totalorder %s40_s6, %s40_s6 }
  0x2b   :  { %p572_p5 = scmp.ne.s32.totalorder %s40_s6, %s571_s23  ;;  %p577_p7 = scmp.lt.s32.totalorder %s571_s23, %s571_s23 }
  0x2d   :  { %p578_p8 = por %p577_p7, %p576_p6 }
  0x2f   :  { %p579_p9 = pnand %p578_p8, %p572_p5 }
  0x31   :  { %582 = shalt.err (!%p579_p9)
}
  0x32   :  { %45 = dma.hbm_to_vmem [thread:$0]  %s733_s2, 2048, %s40_s6, [#allocation6], %s612_s25, %s612_s25, %s613_s26  }
  0x33   :  { %605 = dma.done.wait [#allocation3], 64  }
  0x34   :  { %606 = vsyncadd [#allocation3], 4294967232 }
  0x35   :  { %607 = dma.done.wait [#allocation6], 2240  }
  0x36   :  { %608 = vsyncadd [#allocation6], 4294965056  ;;  %v616_v0 = vmov 0.0   ;;  %vm617_vm0 = vmmov 0   ;;  %v493_v1 = vld [vmem:[#allocation5] sm:$0xff]   ;;  %vm82_vm1 = vcmask 1043456   ;;  %v355_v37 = vlaneseq }
  0x37   :  { %437 = vmatprep.subr.bf16.mxu0 %v616_v0  ;;  %441 = vmatprep.mubr.msk.bf16.mxu0 %vm617_vm0, %v616_v0  ;;  %v494_v2 = vld [vmem:[#allocation5 + $0x8] ss:$0 sps:$4 sm:$0xff]   ;;  %v495_v3 = vld [vmem:[#allocation7] sm:$0xff]   ;;  %v496_v5 = vld [vmem:[#allocation7 + $0x8] sm:$0xff]   ;;  %vm78_vm2 = vcmask 195584   ;;  %s618_s30 = smov [#allocation8]  }
  0x38   :  { %445 = vmatprep.subr.bf16.mxu1 %v616_v0  ;;  %461 = vmatprep.mubr.msk.bf16.mxu1 %vm617_vm0, %v616_v0  ;;  %v84_v4 = vsel %vm82_vm1, %v494_v2, 0  ;;  %v58_v6 = vld [vmem:[#allocation2] sm:$0xf]  ;;  %v498_v8 = vld [vmem:[#allocation7 + $0x18] sm:$0xff]   ;;  %v499_v9 = vld [vmem:[#allocation7 + $0x20] sm:$0xff]   ;;  %v356_v38 = vand.u32 127, %v355_v37 }
  0x39   :  { %438 = vmatpush3.bf16.msra.mxu0 %v493_v1  ;;  %446 = vmatpush3.bf16.msra.mxu1 %v495_v3  ;;  %v497_v7 = vld [vmem:[#allocation7 + $0x10] sm:$0xff]   ;;  %v500_v10 = vld [vmem:[#allocation7 + $0x28] sm:$0xff]   ;;  %v502_v12 = vld [vmem:[#allocation7 + $0x38] sm:$0xff]   ;;  %s382_s5 = sshll.u32 %s618_s30, 4  ;;  %s383_s5 = int_to_ptr.vmem [resolvable:$true] %s382_s5 }
  0x3a   :  { %439 = vmatprep.subr.bf16.mxu0 %v616_v0  ;;  %447 = vmatprep.subr.bf16.mxu1 %v616_v0  ;;  %v501_v11 = vld [vmem:[#allocation7 + $0x30] sm:$0xff]   ;;  %v503_v13 = vld [vmem:[#allocation7 + $0x40] sm:$0xff]   ;;  %v504_v14 = vld [vmem:[#allocation7 + $0x48] sm:$0xff]   ;;  %vm357_vm3 = vcmp.lt.s32.totalorder %v356_v38, 24  ;;  %vm371_vm4 = vcmp.eq.s32.totalorder %v356_v38, 24  ;;  %p588_p11 = scmp.lt.s32.totalorder %s383_s5, %s383_s5 }
  0x3b   :  { %v505_v15 = vld [vmem:[#allocation7 + $0x50] sm:$0xff]   ;;  %v506_v16 = vld [vmem:[#allocation7 + $0x58] sm:$0xff]   ;;  %v507_v17 = vld [vmem:[#allocation7 + $0x60] sm:$0xff]  }
  0x3c   :  { %v508_v18 = vld [vmem:[#allocation7 + $0x68] sm:$0xff]   ;;  %v392_v19 = vld [vmem:[%s734_s3] ss:$0 sm:$0xff]  ;;  %v510_v28 = vld [vmem:[#allocation7 + $0x78] sm:$0xff]  }
  0x3d   :  { %440 = vmatpush3.bf16.msra.mxu0 %v84_v4  ;;  %448 = vmatpush3.bf16.msra.mxu1 %v496_v5  ;;  %v509_v27 = vld [vmem:[#allocation7 + $0x70] sm:$0xff]  }
  0x3e   :  { %465 = vmatprep.subr.bf16.mxu0 %v616_v0  ;;  %449 = vmatprep.subr.bf16.mxu1 %v616_v0  ;;  %v397_v29 = vld [vmem:[%s734_s3 + $0x1] ss:$0 sm:$0xff]  ;;  %v407_v39 = vld [vmem:[%s734_s3 + $0x2] ss:$0 sm:$0xff]  ;;  %s583_s3 = scalar_lea.vmem %s383_s5, 128 }
  0x3f   :  { %p584_p10 = scmp.ne.s32.totalorder %s383_s5, %s583_s3  ;;  %p589_p12 = scmp.lt.s32.totalorder %s583_s3, %s583_s3 }
  0x40   :  { %442 = vmatmul.mubr.msk.bf16.vlgmr.msra.gmra.mrb[0].mxu0 %vm78_vm2, %v58_v6 }
  0x41   :  { %481 = vmatprep.mubr.msk.bf16.mxu0 %vm617_vm0, %v616_v0  ;;  %450 = vmatpush3.bf16.msra.mxu1 %v497_v7  ;;  %p590_p13 = por %p589_p12, %p588_p11 }
  0x42   :  { %451 = vmatprep.subr.bf16.mxu1 %v616_v0  ;;  %466 = vmatpush3.bf16.msra.mxu0 %v503_v13 }
  0x43   :  { %467 = vmatprep.subr.bf16.mxu0 %v616_v0  ;;  %p591_p0 = pnand %p590_p13, %p584_p10 }
  0x45   :  { %452 = vmatpush3.bf16.msra.mxu1 %v498_v8 }
  0x46   :  { %453 = vmatprep.subr.bf16.mxu1 %v616_v0  ;;  %468 = vmatpush3.bf16.msra.mxu0 %v504_v14 }
  0x47   :  { %469 = vmatprep.subr.bf16.mxu0 %v616_v0 }
  0x49   :  { %454 = vmatpush3.bf16.msra.mxu1 %v499_v9 }
  0x4a   :  { %455 = vmatprep.subr.bf16.mxu1 %v616_v0  ;;  %470 = vmatpush3.bf16.msra.mxu0 %v505_v15 }
  0x4b   :  { %471 = vmatprep.subr.bf16.mxu0 %v616_v0 }
  0x4d   :  { %456 = vmatpush3.bf16.msra.mxu1 %v500_v10 }
  0x4e   :  { %457 = vmatprep.subr.bf16.mxu1 %v616_v0  ;;  %472 = vmatpush3.bf16.msra.mxu0 %v506_v16 }
  0x4f   :  { %473 = vmatprep.subr.bf16.mxu0 %v616_v0 }
  0x51   :  { %458 = vmatpush3.bf16.msra.mxu1 %v501_v11 }
  0x52   :  { %459 = vmatprep.subr.bf16.mxu1 %v616_v0  ;;  %474 = vmatpush3.bf16.msra.mxu0 %v507_v17 }
  0x53   :  { %475 = vmatprep.subr.bf16.mxu0 %v616_v0 }
  0x55   :  { %460 = vmatpush3.bf16.msra.mxu1 %v502_v12 }
  0x56   :  { %476 = vmatpush3.bf16.msra.mxu0 %v508_v18 }
  0x57   :  { %477 = vmatprep.subr.bf16.mxu0 %v616_v0 }
  0x5a   :  { %478 = vmatpush3.bf16.msra.mxu0 %v509_v27 }
  0x5b   :  { %479 = vmatprep.subr.bf16.mxu0 %v616_v0 }
  0x5e   :  { %480 = vmatpush3.bf16.msra.mxu0 %v510_v28 }
 0x113   :  { %v120_v20 = vpop.f32.mrb[0].mxu0 }
 0x114   :  { %v121_v21 = vadd.f32 %v392_v19, %v120_v20  ;;  %v443_v22 = vpop.f32.mrb[1].mxu0 }
 0x115   :  { %v123_v23 = vpop.f32.mrb[2].mxu0 }
 0x116   :  { %v126_v24 = vmax.f32 %v121_v21, 0.0  ;;  %v444_v25 = vpop.f32.mrb[3].mxu0 }
 0x118   :  { %v127_v26 = vpack.c.bf16 %v126_v24, %v126_v24 }
 0x11a   :  { %462 = vmatmul.mubr.bf16.vlgmr.msra.gmra.mrb[0].mxu1 %v127_v26 }
 0x1ed   :  { %v234_v30 = vpop.f32.mrb[0].mxu1 }
 0x1ee   :  { %v235_v31 = vadd.f32 %v397_v29, %v234_v30  ;;  %v463_v32 = vpop.f32.mrb[1].mxu1 }
 0x1ef   :  { %v237_v33 = vpop.f32.mrb[2].mxu1 }
 0x1f0   :  { %v240_v34 = vmax.f32 %v235_v31, 0.0  ;;  %v464_v35 = vpop.f32.mrb[3].mxu1 }
 0x1f2   :  { %v241_v36 = vpack.c.bf16 %v240_v34, %v240_v34 }
 0x1f4   :  { %482 = vmatmul.mubr.bf16.vlgmr.msra.gmra.mrb[4].mxu0 %v241_v36 }
 0x2c7   :  { %v349_v40 = vpop.f32.mrb[4].mxu0 }
 0x2c8   :  { %v350_v41 = vadd.f32 %v407_v39, %v349_v40  ;;  %v483_v42 = vpop.f32.mrb[5].mxu0 }
 0x2c9   :  { %v352_v43 = vpop.f32.mrb[6].mxu0 }
 0x2ca   :  { %v484_v44 = vpop.f32.mrb[7].mxu0  ;;  %v360_v45 = vsel %vm357_vm3, %v350_v41, -1e+30 }
 0x2cb   :  { %361 = vmax.xlane.f32.xlu0 %v360_v45 }
 0x358   :  { %v362_v46 = vpop.xlane.xlu0 %361 }
 0x359   :  { %v363_v47 = vsub.f32 %v360_v45, %v362_v46 }
 0x35b   :  { %v364_v48 = vmul.f32 1.442695, %v363_v47 }
 0x35d   :  { %511 = vpow2.f32 %v364_v48 }
 0x367   :  { %v512_v49 = vpop.eup %511 }
 0x368   :  { %366 = vadd.xlane.f32.xlu0 %v512_v49 }
 0x3f5   :  { %v367_v50 = vpop.xlane.xlu0 %366 }
 0x3f6   :  { %513 = vrcp.f32 %v367_v50 }
 0x3f7   :  { %515 = vtanh.f32 %v350_v41 }
 0x400   :  { %v514_v51 = vpop.eup %513 }
 0x401   :  { %v369_v52 = vmul.f32 %v514_v51, %v512_v49  ;;  %v516_v53 = vpop.eup %515 }
 0x403   :  { %v374_v54 = vsel %vm371_vm4, %v516_v53, %v369_v52 }
 0x404   :  { %375 = vst [vmem:[#allocation8] sm:$0xff] %v374_v54 }
 0x405   :  { %594 = shalt.err (!%p591_p0)
}
 0x406   :  { %s595_s8 = scalar_lea.hbm %s735_s4, 128 }
 0x407   :  { %p596_p1 = scmp.ne.s32.totalorder %s735_s4, %s595_s8  ;;  %p599_p2 = scmp.lt.u32.totalorder %s595_s8, %s735_s4 }
 0x409   :  { %p601_p3 = pnand %p599_p2, %p596_p1 }
 0x40b   :  { %604 = shalt.err (!%p601_p3)
}
 0x40c   :  { %385 = dma.vmem_to_hbm [thread:$0]  %s383_s5, 128, %s735_s4, [#allocation4]  }
 0x40d   :  { %609 = dma.done.wait [#allocation4], 128  }
 0x40e   :  { %610 = vsyncadd [#allocation4], 4294967168 }
 0x40f   :  { %389 = vsyncpa [#allocation3], 1 }
 0x410   :  { %390 = vsyncpa [#allocation6], 1 }
 0x411   :  { %391 = vsyncpa [#allocation4], 1 }

</bundles_post_ra>
